<compile_context>
chip_gen: v5e
topology: v5e:2x2
jax: 0.10.0
libtpu: 0.0.40
codegen_flags: <defaults>
</compile_context>

<pallas_src>
import jax
import jax.numpy as jnp
from jax.experimental import pallas as pl
from jax.experimental.pallas import tpu as pltpu


def _round_up(n, m):
    return ((n + m - 1) // m) * m


def _mlp_logsoftmax_kernel(
    x_ref,
    w1_ref, b1_ref,
    w2_ref, b2_ref,
    w3_ref, b3_ref,
    w4_ref, b4_ref,
    out_ref,
):
    # f32 -> bf16 cast happens in VMEM, hidden under the matmuls (VPU op).
    x = x_ref[...].astype(jnp.bfloat16)

    # fc1 -> relu   (dropout = identity at inference)
    h = jnp.dot(x, w1_ref[...], preferred_element_type=jnp.float32)
    h = jnp.maximum(h + b1_ref[...], 0.0)

    # fc2 -> relu
    h = jnp.dot(h.astype(jnp.bfloat16), w2_ref[...],
                preferred_element_type=jnp.float32)
    h = jnp.maximum(h + b2_ref[...], 0.0)

    # fc3 -> relu   (output padded 64 -> 128; pad columns are exactly 0)
    h = jnp.dot(h.astype(jnp.bfloat16), w3_ref[...],
                preferred_element_type=jnp.float32)
    h = jnp.maximum(h + b3_ref[...], 0.0)

    # fc4           (output padded to 128 lanes; padded bias lanes are -inf)
    logits = jnp.dot(h.astype(jnp.bfloat16), w4_ref[...],
                     preferred_element_type=jnp.float32)
    logits = logits + b4_ref[...]

    # LogSoftmax over dim=1: padded lanes are -inf -> exp()==0, normalization exact.
    m = jnp.max(logits, axis=-1, keepdims=True)
    z = logits - m
    lse = jnp.log(jnp.sum(jnp.exp(z), axis=-1, keepdims=True))
    out_ref[...] = (z - lse).astype(out_ref.dtype)


def prepare_kernel_params(params, output_size):
    """Pad fc3/fc4 to lane-dense 128-multiples and cast weights to bf16."""
    H3 = 128                                    # fc3 output 64 -> 128
    OUT = _round_up(max(output_size, 1), 128)   # classifier width -> 128 multiple

    w3, b3 = params["w3"], params["b3"]         # [128, 64], [1, 64]
    w4, b4 = params["w4"], params["b4"]         # [64, out], [1, out]

    w3p = jnp.zeros((w3.shape[0], H3), jnp.float32).at[:, : w3.shape[1]].set(w3)
    b3p = jnp.zeros((1, H3), jnp.float32).at[:, : b3.shape[1]].set(b3)
    w4p = jnp.zeros((H3, OUT), jnp.float32).at[: w4.shape[0], : w4.shape[1]].set(w4)
    b4p = jnp.full((1, OUT), -jnp.inf, jnp.float32).at[:, : b4.shape[1]].set(b4)

    return {
        "w1": params["w1"].astype(jnp.bfloat16), "b1": params["b1"].astype(jnp.float32),
        "w2": params["w2"].astype(jnp.bfloat16), "b2": params["b2"].astype(jnp.float32),
        "w3": w3p.astype(jnp.bfloat16),          "b3": b3p,
        "w4": w4p.astype(jnp.bfloat16),          "b4": b4p,
    }


def _pick_batch_tile(B, max_tile):
    """Batch tile: multiple of 16 (bf16 sublane packing).

    VMEM is not a binding constraint here even at TB=2048 (per-step working set
    is a few MiB), so the cap exists only to (a) amortize per-grid-step overhead
    with large tiles and (b) keep >= 2 grid steps when B > 16 so both v7x
    TensorCores receive work under "parallel" grid sharding.
    """
    if B <= 16:
        return 16
    return max(16, min(max_tile, _round_up((B + 1) // 2, 16)))


def nn_classifier_forward(x, kernel_params, output_size, *, max_tile=2048):
    """x: [B, input_size] float32. kernel_params: output of prepare_kernel_params.

    Returns bf16 log-probabilities of shape [B, output_size].
    """
    B, input_size = x.shape
    out_pad = kernel_params["w4"].shape[1]

    TB = _pick_batch_tile(B, max_tile)
    B_pad = _round_up(B, TB)

    # Keep x in f32; the bf16 cast happens inside the kernel (no extra HBM pass).
    # Pad the batch tail (single op) only if needed.
    xp = x
    if B_pad != B:
        xp = jnp.zeros((B_pad, input_size), x.dtype).at[:B].set(x)

    args = (
        xp,
        kernel_params["w1"], kernel_params["b1"],
        kernel_params["w2"], kernel_params["b2"],
        kernel_params["w3"], kernel_params["b3"],
        kernel_params["w4"], kernel_params["b4"],
    )

    # Weights/biases: full-array blocks, constant index_map -> VMEM resident
    # across all grid steps while x/out tiles are pipelined underneath.
    const_spec = lambda a: pl.BlockSpec(a.shape, lambda i: (0, 0))
    in_specs = [pl.BlockSpec((TB, input_size), lambda i: (i, 0))]
    in_specs += [const_spec(a) for a in args[1:]]

    weight_bytes = sum(int(a.size) * a.dtype.itemsize for a in args[1:])
    cost = pl.CostEstimate(
        flops=2 * B_pad * (input_size * 256 + 256 * 128 + 128 * 128 + 128 * out_pad),
        transcendentals=B_pad * (out_pad + 1),            # exp + log per row
        bytes_accessed=B_pad * input_size * 4 + B_pad * out_pad * 2 + weight_bytes,
    )

    out = pl.pallas_call(
        _mlp_logsoftmax_kernel,
        out_shape=jax.ShapeDtypeStruct((B_pad, out_pad), jnp.bfloat16),
        grid=(B_pad // TB,),
        in_specs=in_specs,
        out_specs=pl.BlockSpec((TB, out_pad), lambda i: (i, 0)),
        compiler_params=pltpu.CompilerParams(
            dimension_semantics=("parallel",),
            vmem_limit_bytes=32 * 1024 * 1024,  # headroom on v5e's 16 MiB default
        ),
        cost_estimate=cost,
    )(*args)

    # NOTE: padded output lanes hold -inf; always slice to output_size before
    # any reduction over the last axis.
    return out[:B, :output_size]


def init_params(key, input_size, output_size):
    """Deterministic init. Weights stored as [in, out] (transposed vs torch)."""
    sizes = [(input_size, 256), (256, 128), (128, 64), (64, output_size)]
    params = {}
    for i, (fan_in, fan_out) in enumerate(sizes, start=1):
        key, kw, kb = jax.random.split(key, 3)
        bound = 1.0 / jnp.sqrt(fan_in)  # matches nn.Linear default uniform init
        params[f"w{i}"] = jax.random.uniform(
            kw, (fan_in, fan_out), jnp.float32, -bound, bound)
        params[f"b{i}"] = jax.random.uniform(
            kb, (1, fan_out), jnp.float32, -bound, bound)
    return params


def reference_forward(x, params):
    """Pure-JAX reference mirroring the kernel's bf16-weight / bf16-activation path."""
    r = lambda a: a.astype(jnp.bfloat16).astype(jnp.float32)  # bf16 rounding
    h = r(x)
    h = jnp.maximum(h @ r(params["w1"]) + params["b1"], 0.0)
    h = jnp.maximum(r(h) @ r(params["w2"]) + params["b2"], 0.0)
    h = jnp.maximum(r(h) @ r(params["w3"]) + params["b3"], 0.0)
    logits = r(h) @ r(params["w4"]) + params["b4"]
    return jax.nn.log_softmax(logits, axis=1)


if __name__ == "__main__":
    B, INPUT_SIZE, HIDDEN_SIZE, OUTPUT_SIZE = 24, 32, 256, 10

    key = jax.random.PRNGKey(0)
    key, kx = jax.random.split(key)
    x = jax.random.normal(kx, (B, INPUT_SIZE), jnp.float32)
    params = init_params(key, INPUT_SIZE, OUTPUT_SIZE)
    kparams = prepare_kernel_params(params, OUTPUT_SIZE)

    # B=24 -> TB=16, B_pad=32, grid=2: exercises a multi-step grid + tail padding.
    out = jax.block_until_ready(
        nn_classifier_forward(x, kparams, OUTPUT_SIZE))
    ref = reference_forward(x, params)

    assert out.shape == (B, OUTPUT_SIZE)
    assert out.dtype == jnp.bfloat16
    out_f32 = out.astype(jnp.float32)
    assert bool(jnp.all(jnp.isfinite(out_f32))), "non-finite values in output"
    # bf16 output: ~8-bit mantissa on log-probs of magnitude ~2-4 -> ~2e-2 abs.
    assert jnp.allclose(out_f32, ref, atol=3e-2, rtol=3e-2), "mismatch vs reference"
    print("KERNEL_OK")
</pallas_src>

<mosaic_0001>
module attributes {stable_mosaic.version = 11 : i64} {
  func.func @_mlp_logsoftmax_kernel(%arg0: i32, %arg1: memref<16x32xf32, #tpu.memory_space<vmem>>, %arg2: memref<32x256xbf16, #tpu.memory_space<vmem>>, %arg3: memref<1x256xf32, #tpu.memory_space<vmem>>, %arg4: memref<256x128xbf16, #tpu.memory_space<vmem>>, %arg5: memref<1x128xf32, #tpu.memory_space<vmem>>, %arg6: memref<128x128xbf16, #tpu.memory_space<vmem>>, %arg7: memref<1x128xf32, #tpu.memory_space<vmem>>, %arg8: memref<128x128xbf16, #tpu.memory_space<vmem>>, %arg9: memref<1x128xf32, #tpu.memory_space<vmem>>, %arg10: memref<16x128xbf16, #tpu.memory_space<vmem>>) attributes {dimension_semantics = [#tpu.dimension_semantics<parallel>], iteration_bounds = array<i64: 2>, scalar_prefetch = 0 : i64, scratch_operands = 0 : i64, tpu.core_type = #tpu.core_type<tc>, window_params = [{transform_indices = @transform_0, window_bounds = array<i64: 16, 32>}, {pipeline_mode = #tpu.pipeline_mode<synchronous>, transform_indices = @transform_1, window_bounds = array<i64: 32, 256>}, {pipeline_mode = #tpu.pipeline_mode<synchronous>, transform_indices = @transform_2, window_bounds = array<i64: 1, 256>}, {pipeline_mode = #tpu.pipeline_mode<synchronous>, transform_indices = @transform_3, window_bounds = array<i64: 256, 128>}, {pipeline_mode = #tpu.pipeline_mode<synchronous>, transform_indices = @transform_4, window_bounds = array<i64: 1, 128>}, {pipeline_mode = #tpu.pipeline_mode<synchronous>, transform_indices = @transform_5, window_bounds = array<i64: 128, 128>}, {pipeline_mode = #tpu.pipeline_mode<synchronous>, transform_indices = @transform_6, window_bounds = array<i64: 1, 128>}, {pipeline_mode = #tpu.pipeline_mode<synchronous>, transform_indices = @transform_7, window_bounds = array<i64: 128, 128>}, {pipeline_mode = #tpu.pipeline_mode<synchronous>, transform_indices = @transform_8, window_bounds = array<i64: 1, 128>}, {transform_indices = @transform_9, window_bounds = array<i64: 16, 128>}]} {
    %c0 = arith.constant 0 : index
    %c0_0 = arith.constant 0 : index
    %0 = vector.load %arg1[%c0, %c0_0] : memref<16x32xf32, #tpu.memory_space<vmem>>, vector<16x32xf32>
    %1 = arith.truncf %0 : vector<16x32xf32> to vector<16x32xbf16>
    %c0_1 = arith.constant 0 : index
    %c0_2 = arith.constant 0 : index
    %2 = vector.load %arg2[%c0_1, %c0_2] : memref<32x256xbf16, #tpu.memory_space<vmem>>, vector<32x256xbf16>
    %cst = arith.constant dense<0.000000e+00> : vector<16x256xf32>
    %3 = tpu.matmul %1, %2, %cst {dimension_numbers = #tpu.dot_dimension_numbers<[1], [0], [0], [1], [0, 0, 1, 1], [], []>} : vector<16x32xbf16>, vector<32x256xbf16>, vector<16x256xf32> -> vector<16x256xf32>
    %c0_3 = arith.constant 0 : index
    %c0_4 = arith.constant 0 : index
    %4 = vector.load %arg3[%c0_3, %c0_4] : memref<1x256xf32, #tpu.memory_space<vmem>>, vector<1x256xf32>
    %5 = vector.broadcast %4 : vector<1x256xf32> to vector<16x256xf32>
    %6 = arith.addf %3, %5 : vector<16x256xf32>
    %cst_5 = arith.constant 0.000000e+00 : f32
    %7 = vector.broadcast %cst_5 : f32 to vector<16x256xf32>
    %8 = arith.maximumf %6, %7 : vector<16x256xf32>
    %9 = arith.truncf %8 : vector<16x256xf32> to vector<16x256xbf16>
    %c0_6 = arith.constant 0 : index
    %c0_7 = arith.constant 0 : index
    %10 = vector.load %arg4[%c0_6, %c0_7] : memref<256x128xbf16, #tpu.memory_space<vmem>>, vector<256x128xbf16>
    %cst_8 = arith.constant dense<0.000000e+00> : vector<16x128xf32>
    %11 = tpu.matmul %9, %10, %cst_8 {dimension_numbers = #tpu.dot_dimension_numbers<[1], [0], [0], [1], [0, 0, 1, 1], [], []>} : vector<16x256xbf16>, vector<256x128xbf16>, vector<16x128xf32> -> vector<16x128xf32>
    %c0_9 = arith.constant 0 : index
    %c0_10 = arith.constant 0 : index
    %12 = vector.load %arg5[%c0_9, %c0_10] : memref<1x128xf32, #tpu.memory_space<vmem>>, vector<1x128xf32>
    %13 = vector.broadcast %12 : vector<1x128xf32> to vector<16x128xf32>
    %14 = arith.addf %11, %13 : vector<16x128xf32>
    %cst_11 = arith.constant 0.000000e+00 : f32
    %15 = vector.broadcast %cst_11 : f32 to vector<16x128xf32>
    %16 = arith.maximumf %14, %15 : vector<16x128xf32>
    %17 = arith.truncf %16 : vector<16x128xf32> to vector<16x128xbf16>
    %c0_12 = arith.constant 0 : index
    %c0_13 = arith.constant 0 : index
    %18 = vector.load %arg6[%c0_12, %c0_13] : memref<128x128xbf16, #tpu.memory_space<vmem>>, vector<128x128xbf16>
    %cst_14 = arith.constant dense<0.000000e+00> : vector<16x128xf32>
    %19 = tpu.matmul %17, %18, %cst_14 {dimension_numbers = #tpu.dot_dimension_numbers<[1], [0], [0], [1], [0, 0, 1, 1], [], []>} : vector<16x128xbf16>, vector<128x128xbf16>, vector<16x128xf32> -> vector<16x128xf32>
    %c0_15 = arith.constant 0 : index
    %c0_16 = arith.constant 0 : index
    %20 = vector.load %arg7[%c0_15, %c0_16] : memref<1x128xf32, #tpu.memory_space<vmem>>, vector<1x128xf32>
    %21 = vector.broadcast %20 : vector<1x128xf32> to vector<16x128xf32>
    %22 = arith.addf %19, %21 : vector<16x128xf32>
    %cst_17 = arith.constant 0.000000e+00 : f32
    %23 = vector.broadcast %cst_17 : f32 to vector<16x128xf32>
    %24 = arith.maximumf %22, %23 : vector<16x128xf32>
    %25 = arith.truncf %24 : vector<16x128xf32> to vector<16x128xbf16>
    %c0_18 = arith.constant 0 : index
    %c0_19 = arith.constant 0 : index
    %26 = vector.load %arg8[%c0_18, %c0_19] : memref<128x128xbf16, #tpu.memory_space<vmem>>, vector<128x128xbf16>
    %cst_20 = arith.constant dense<0.000000e+00> : vector<16x128xf32>
    %27 = tpu.matmul %25, %26, %cst_20 {dimension_numbers = #tpu.dot_dimension_numbers<[1], [0], [0], [1], [0, 0, 1, 1], [], []>} : vector<16x128xbf16>, vector<128x128xbf16>, vector<16x128xf32> -> vector<16x128xf32>
    %c0_21 = arith.constant 0 : index
    %c0_22 = arith.constant 0 : index
    %28 = vector.load %arg9[%c0_21, %c0_22] : memref<1x128xf32, #tpu.memory_space<vmem>>, vector<1x128xf32>
    %29 = vector.broadcast %28 : vector<1x128xf32> to vector<16x128xf32>
    %30 = arith.addf %27, %29 : vector<16x128xf32>
    %cst_23 = arith.constant dense<0xFF800000> : vector<16xf32>
    %31 = vector.multi_reduction <maximumf>, %30, %cst_23 [1] : vector<16x128xf32> to vector<16xf32>
    %32 = vector.shape_cast %31 : vector<16xf32> to vector<16x1xf32>
    %33 = vector.broadcast %32 : vector<16x1xf32> to vector<16x128xf32>
    %34 = arith.subf %30, %33 : vector<16x128xf32>
    %35 = math.exp %34 : vector<16x128xf32>
    %cst_24 = arith.constant dense<0.000000e+00> : vector<16xf32>
    %36 = vector.multi_reduction <add>, %35, %cst_24 [1] : vector<16x128xf32> to vector<16xf32>
    %37 = vector.shape_cast %36 : vector<16xf32> to vector<16x1xf32>
    %38 = math.log %37 : vector<16x1xf32>
    %39 = vector.broadcast %38 : vector<16x1xf32> to vector<16x128xf32>
    %40 = arith.subf %34, %39 : vector<16x128xf32>
    %41 = arith.truncf %40 : vector<16x128xf32> to vector<16x128xbf16>
    %c0_25 = arith.constant 0 : index
    %c0_26 = arith.constant 0 : index
    %42 = vector.load %arg10[%c0_25, %c0_26] : memref<16x128xbf16, #tpu.memory_space<vmem>>, vector<16x128xbf16>
    tpu.vector_store %arg10[%c0_25, %c0_26], %41 {strides = array<i32>} : memref<16x128xbf16, #tpu.memory_space<vmem>>, vector<16x128xbf16>,
    return
  }
  func.func @transform_0(%arg0: i32) -> (i32, i32) {
    %c0_i32 = arith.constant 0 : i32
    %c0_i32_0 = arith.constant 0 : i32
    return %arg0, %c0_i32 : i32, i32
  }
  func.func @transform_1(%arg0: i32) -> (i32, i32) {
    %c0_i32 = arith.constant 0 : i32
    %c0_i32_0 = arith.constant 0 : i32
    %c0_i32_1 = arith.constant 0 : i32
    return %c0_i32, %c0_i32_0 : i32, i32
  }
  func.func @transform_2(%arg0: i32) -> (i32, i32) {
    %c0_i32 = arith.constant 0 : i32
    %c0_i32_0 = arith.constant 0 : i32
    %c0_i32_1 = arith.constant 0 : i32
    return %c0_i32, %c0_i32_0 : i32, i32
  }
  func.func @transform_3(%arg0: i32) -> (i32, i32) {
    %c0_i32 = arith.constant 0 : i32
    %c0_i32_0 = arith.constant 0 : i32
    %c0_i32_1 = arith.constant 0 : i32
    return %c0_i32, %c0_i32_0 : i32, i32
  }
  func.func @transform_4(%arg0: i32) -> (i32, i32) {
    %c0_i32 = arith.constant 0 : i32
    %c0_i32_0 = arith.constant 0 : i32
    %c0_i32_1 = arith.constant 0 : i32
    return %c0_i32, %c0_i32_0 : i32, i32
  }
  func.func @transform_5(%arg0: i32) -> (i32, i32) {
    %c0_i32 = arith.constant 0 : i32
    %c0_i32_0 = arith.constant 0 : i32
    %c0_i32_1 = arith.constant 0 : i32
    return %c0_i32, %c0_i32_0 : i32, i32
  }
  func.func @transform_6(%arg0: i32) -> (i32, i32) {
    %c0_i32 = arith.constant 0 : i32
    %c0_i32_0 = arith.constant 0 : i32
    %c0_i32_1 = arith.constant 0 : i32
    return %c0_i32, %c0_i32_0 : i32, i32
  }
  func.func @transform_7(%arg0: i32) -> (i32, i32) {
    %c0_i32 = arith.constant 0 : i32
    %c0_i32_0 = arith.constant 0 : i32
    %c0_i32_1 = arith.constant 0 : i32
    return %c0_i32, %c0_i32_0 : i32, i32
  }
  func.func @transform_8(%arg0: i32) -> (i32, i32) {
    %c0_i32 = arith.constant 0 : i32
    %c0_i32_0 = arith.constant 0 : i32
    %c0_i32_1 = arith.constant 0 : i32
    return %c0_i32, %c0_i32_0 : i32, i32
  }
  func.func @transform_9(%arg0: i32) -> (i32, i32) {
    %c0_i32 = arith.constant 0 : i32
    %c0_i32_0 = arith.constant 0 : i32
    return %arg0, %c0_i32 : i32, i32
  }
}

</mosaic_0001>

<bundles_post_ra>
// kernel: tpu_custom_call.1
= control target key start
LH: loop header
LB: loop body
LE: loop exit
PB: predicated region body
PF: predicated region fallthrough
CT: control target
= control target key end

     0   :  { %s1833_s0 = inlined_call_operand.hbm [shape: f32[32,32], index: 0, kind: input, shape index: {}]   ;;  %s1834_s1 = inlined_call_operand.hbm [shape: bf16[32,256], index: 1, kind: input, shape index: {}]   ;;  %s1835_s2 = inlined_call_operand.hbm [shape: f32[1,256], index: 2, kind: input, shape index: {}]   ;;  %s1836_s3 = inlined_call_operand.hbm [shape: bf16[256,128], index: 3, kind: input, shape index: {}]   ;;  %s1837_s4 = inlined_call_operand.vmem [shape: f32[1,128], index: 4, kind: input, shape index: {}]   ;;  %s1838_s5 = inlined_call_operand.hbm [shape: bf16[128,128], index: 5, kind: input, shape index: {}]   ;;  %s1839_s6 = inlined_call_operand.vmem [shape: f32[1,128], index: 6, kind: input, shape index: {}]   ;;  %s1840_s7 = inlined_call_operand.hbm [shape: bf16[128,128], index: 7, kind: input, shape index: {}]   ;;  %s1841_s8 = inlined_call_operand.vmem [shape: f32[1,128], index: 8, kind: input, shape index: {}]   ;;  %s1842_s9 = inlined_call_operand.hbm [shape: bf16[32,128], index: 9, kind: output, shape index: {}]  }
   0x1   :  { %1845 = sst [smem:[#allocation19_spill]] %s1834_s1 }
   0x2   :  { %1846 = sst [smem:[#allocation20_spill]] %s1835_s2 }
   0x3   :  { %1847 = sst [smem:[#allocation21_spill]] %s1836_s3 }
   0x4   :  { %14 = vsyncpa [#allocation3], 0 }
   0x5   :  { %16 = vsyncpa [#allocation3 + $0x1], 0 }
   0x6   :  { %17 = vsyncpa [#allocation6], 0 }
   0x7   :  { %18 = vsyncpa [#allocation9], 0 }
   0x8   :  { %19 = vsyncpa [#allocation12], 0 }
   0x9   :  { %20 = vsyncpa [#allocation4], 0 }
   0xa   :  { %22 = vsyncpa [#allocation4 + $0x1], 0  ;;  %s1647_s30 = smov 0   ;;  %s1649_s10 = smov 0  }
   0xb   :  { %s1651_s11 = smov 0   ;;  %s1653_s12 = smov 0  }
   0xc LB: > { %s1848_s1 = sld [smem:[#allocation19_spill]]  ;;  %s1671_s16 = sadd.s32 4294967295, %s1584_s12   ;;  %s1584_s12 = sphi %s1653_s12, %s1863_s12   ;;  %s1580_s11 = sphi %s1651_s11, %s1862_s11   ;;  %s1576_s10 = sphi %s1649_s10, %s1861_s10   ;;  %s1572_s30 = sphi %s1647_s30, %s1860_s30  }
   0xd   : > { %p1000_p0 = scmp.ge.s32.totalorder %s1584_s12, 1  ;;  %p49_p1 = scmp.eq.s32.totalorder %s1671_s16, 0 }
   0xe   : > { %p253_p2 = scmp.lt.s32.totalorder %s1584_s12, 3  ;;  %s1586_s18 = smov [#allocation5]  }
   0xf   : > { %s266_s19 = sshll.u32 %s1586_s18, 4  ;;  %s1850_s3 = sld [smem:[#allocation21_spill]]  ;;  %s267_s19 = int_to_ptr.vmem [resolvable:$true] %s266_s19 }
  0x10   : > { %p1676_p3 = pnand %p1000_p0, %p253_p2  ;;  %s1587_s24 = smov [#allocation8]  }
  0x11   : > { %s292_s25 = sshll.u32 %s1587_s24, 4  ;;  %s1843_s26 = smov 128   ;;  %s293_s25 = int_to_ptr.vmem [resolvable:$true] %s292_s25 }
  0x12   : > { %s264_s15 = sshll.u32 %s1848_s1, 4  ;;  %p1236_p4 = pneg %p1676_p3  ;;  %s265_s15 = int_to_ptr.hbm [resolvable:$true] %s264_s15 }
  0x13   : > { %s1844_s27 = smov 8   ;;  %s1590_s28 = smov 64  }
  0x14   : > { %p1688_p6 = pnand %p1236_p4, %p49_p1  ;;  %s1591_s29 = smov 4  }
  0x15   : > { %s290_s22 = sshll.u32 %s1850_s3, 4  ;;  %s1852_s2 = sld [smem:[#allocation20_spill]]  ;;  %s291_s22 = int_to_ptr.hbm [resolvable:$true] %s290_s22 }
  0x16   : > { %1239 = dma.hbm_to_vmem [thread:$0]  (!%p1688_p6), %s265_s15, 512, %s267_s19, [#allocation6], %s1843_s26, %s1843_s26, %s1844_s27  }
  0x17   : > { %1245 = dma.hbm_to_vmem [thread:$0]  (!%p1688_p6), %s291_s22, 2048, %s293_s25, [#allocation9], %s1590_s28, %s1590_s28, %s1591_s29  }
  0x18   : > { %s1592_s20 = smov [#allocation7]   ;;  %s307_s15 = sshll.u32 %s1838_s5, 4  ;;  %s308_s15 = int_to_ptr.hbm [resolvable:$true] %s307_s15 }
  0x19   : > { %s281_s21 = sshll.u32 %s1592_s20, 4  ;;  %s1593_s19 = smov [#allocation10]   ;;  %s282_s21 = int_to_ptr.vmem [resolvable:$true] %s281_s21 }
  0x1a   : > { %s309_s22 = sshll.u32 %s1593_s19, 4  ;;  %s324_s14 = sshll.u32 %s1840_s7, 4  ;;  %s310_s22 = int_to_ptr.vmem [resolvable:$true] %s309_s22  ;;  %s325_s14 = int_to_ptr.hbm [resolvable:$true] %s324_s14 }
  0x1b   : > { %s279_s18 = sshll.u32 %s1852_s2, 4  ;;  %s1594_s1 = smov [#allocation11]   ;;  %s280_s18 = int_to_ptr.hbm [resolvable:$true] %s279_s18 }
  0x1c   : > { %1242 = dma.hbm_to_vmem [thread:$0]  (!%p1688_p6), %s280_s18, 32, %s282_s21, [#allocation6]  }
  0x1d   : > { %1248 = dma.hbm_to_vmem [thread:$0]  (!%p1688_p6), %s308_s15, 1024, %s310_s22, [#allocation9], %s1590_s28, %s1590_s28, %s1591_s29  }
  0x1e   : > { %s326_s18 = sshll.u32 %s1594_s1, 4  ;;  %s999_s20 = sadd.s32 4294967294, %s1584_s12   ;;  %s327_s18 = int_to_ptr.vmem [resolvable:$true] %s326_s18 }
  0x1f   : > { %1251 = dma.hbm_to_vmem [thread:$0]  (!%p1688_p6), %s325_s14, 1024, %s327_s18, [#allocation12], %s1590_s28, %s1590_s28, %s1591_s29  }
  0x20   : > { %s1716_s21 = sadd.s32 1, %s1584_s12   ;;  %s35_s24 = sadd.s32 1, %s1580_s11 }
  0x21   : > { %s32_s19 = ssub.s32 %s1584_s12, %s1716_s21  ;;  %p42_p7 = scmp.ne.s32.totalorder %s1580_s11, %s1576_s10 }
  0x22   : > { %p33_p8 = scmp.eq.s32.totalorder %s32_s19, 0  ;;  %p43_p9 = scmp.eq.s32.totalorder %s1584_s12, 0 }
  0x23   : > { %p48_p10 = scmp.ne.s32.totalorder %s1576_s10, %s1572_s30  ;;  %p240_p11 = scmp.eq.s32.totalorder %s1671_s16, 1 }
  0x24   : > { %s1728_s15 = scalar_select %p33_p8, %s1580_s11, %s35_s24  }
  0x25   : > { %p1732_p12 = por %p49_p1, %p48_p10  ;;  %p1736_p13 = por %p240_p11, %p42_p7 }
  0x26   : > { %p246_p0 = scmp.eq.s32.totalorder %s999_s20, 1  ;;  %p44_p2 = por %p43_p9, %p42_p7 }
  0x27   : > { %s343_s29 = sand.u32 1, %s1580_s11   ;;  %p1265_p6 = scmp.lt.s32.totalorder %s1584_s12, 2 }
  0x28   : > { %p1741_p4 = por %p246_p0, %p48_p10  ;;  %s1007_s25 = sshll.u32 %s343_s29, 4 }
  0x29   : > { %s1169_s13 = sshll.u32 %s1584_s12, 4  ;;  %s347_s19 = scalar_lea.vmem [#allocation2], %s1007_s25 }
  0x2a   : > { %s352_s18 = scalar_lea.hbm %s1833_s0, %s1169_s13  ;;  %s355_s26 = sshll.u32 %s347_s19, 4  ;;  %s356_s26 = int_to_ptr.vmem [resolvable:$true] %s355_s26 }
  0x2b   : > { %s353_s24 = sshll.u32 %s352_s18, 4  ;;  %p1750_p8 = pnand %p1265_p6, %p44_p2  ;;  %s354_s24 = int_to_ptr.hbm [resolvable:$true] %s353_s24 }
  0x2c   : > { %s344_s27 = scalar_lea.sflag [#allocation3], %s343_s29  ;;  %s1476_s2 = sshra.s32 %s354_s24, 4  ;;  %s1477_s2 = int_to_ptr.hbm [resolvable:$true] %s1476_s2 }
  0x2d   : > { %s1478_s3 = scalar_lea.hbm %s1477_s2, 16  ;;  %p1480_p9 = pneg %p1750_p8 }
  0x2e   : > { %p1479_p7 = scmp.ne.s32.totalorder %s1477_s2, %s1478_s3  ;;  %s1483_s25 = scalar_lea.hbm %s1833_s0, 32 }
  0x2f   : > { %p1484_p0 = scmp.lt.s32.totalorder %s1477_s2, %s1833_s0  ;;  %p1485_p2 = scmp.lt.s32.totalorder %s1483_s25, %s1478_s3 }
  0x30   : > { %p1481_p10 = pnand %p1480_p9, %p1479_p7 }
  0x31   : > { %p1486_p6 = por %p1485_p2, %p1484_p0 }
  0x32   : > { %p1482_p11 = pneg %p1481_p10 }
  0x34   : > { %p1487_p5 = pnand %p1486_p6, %p1482_p11 }
  0x36   : > { %1490 = shalt.err (!%p1487_p5)
}
  0x37   : > { %s1857_s29 = smov 8   ;;  %s1858_s19 = smov 128  }
  0x38   : > { %1255 = dma.hbm_to_vmem [thread:$0]  (!%p1750_p8), %s354_s24, 256, %s356_s26, %s344_s27, %s1858_s19, %s1858_s19, %s1857_s29  }
  0x39   : > { %367 = sbr.rel (%p1676_p3) target bundleno = 903 (0x387), region = 56  ;;  %s1770_s13 = sand.u32 (!%p1676_p3), 1, %s1576_s10  }
  0x3a   : > { %s1011_s2 = sshll.u32 (!%p1676_p3), %s1770_s13, 4  ;;  %s370_s3 = scalar_lea.sflag (!%p1676_p3), [#allocation3], %s1770_s13 }
  0x3b   : > { %s373_s14 = scalar_lea.vmem (!%p1676_p3), [#allocation2], %s1011_s2 }
  0x3e   : > { %1551 = dma.done.wait (%p1732_p12), %s370_s3, 256  }
  0x3f   : > { %1553 = vsyncadd (%p1732_p12), %s370_s3, 4294967040 }
  0x40   : > { %1555 = dma.done.wait (%p49_p1), [#allocation6], 544  }
  0x41   : > { %1557 = vsyncadd (%p49_p1), [#allocation6], 4294966752 }
  0x42   : > { %1559 = dma.done.wait (%p49_p1), [#allocation9], 3072  }
  0x43   : > { %1561 = vsyncadd (%p49_p1), [#allocation9], 4294964224 }
  0x44   : > { %1563 = dma.done.wait (%p49_p1), [#allocation12], 1024  }
  0x45   : > { %1565 = vsyncadd (%p49_p1), [#allocation12], 4294966272  ;;  %v1028_v0 = vld [vmem:[#allocation5 + $0x10] sm:$0xf]  ;;  %v1173_v1 = vld [vmem:[#allocation5 + $0x14] sm:$0xf0] }
  0x46   : > { %v1172_v2 = vld [vmem:[#allocation5 + $0x14] sm:$0xf]  ;;  %v1029_v3 = vor.u32 %v1173_v1, %v1028_v0  ;;  %v1030_v4 = vld [vmem:[#allocation5 + $0x18] sm:$0xf0]  ;;  %v1020_v5 = vld [vmem:[#allocation5] sm:$0xf] }
  0x47   : > { %v1171_v6 = vld [vmem:[#allocation5 + $0x4] sm:$0xf0]  ;;  %v1033_v7 = vor.u32 %v1172_v2, %v1030_v4  ;;  %v1170_v8 = vld [vmem:[#allocation5 + $0x4] sm:$0xf]  ;;  %v1022_v9 = vld [vmem:[#allocation5 + $0x8] sm:$0xf0] }
  0x48   : > { %v437_v10 = vld [vmem:[%s373_s14] sm:$0xff]  ;;  %480 = vmatpush.bf16.msra.mxu0 %v1029_v3  ;;  %v1021_v11 = vor.u32 %v1171_v6, %v1020_v5  ;;  %v438_v12 = vld [vmem:[%s373_s14 + $0x8] sm:$0xff]  ;;  %v1025_v15 = vor.u32 %v1170_v8, %v1022_v9  ;;  %vm470_vm0 = vcmask 261120   ;;  %s1017_s25 = sshll.u32 %s1770_s13, 3  ;;  %s1206_s1 = sshll.u32 %s1671_s16, 3 }
  0x49   : > { %v1181_v13 = vld [vmem:[#allocation8 + $0x38] sm:$0xff]  ;;  %494 = vmatpush.bf16.msra.mxu1 %v1033_v7  ;;  %v1180_v16 = vld [vmem:[#allocation8 + $0x30] sm:$0xff]  ;;  %v439_v18 = vpack.c.bf16 %v438_v12, %v437_v10  ;;  %v1179_v19 = vld [vmem:[#allocation8 + $0x28] sm:$0xff]  ;;  %s874_s19 = scalar_lea.hbm %s1842_s9, %s1206_s1  ;;  %s433_s2 = scalar_lea.vmem [#allocation13], %s1017_s25 }
  0x4a   : > { %v1189_v14 = vld [vmem:[#allocation8 + $0x78] sm:$0xff]  ;;  %640 = vmatpush.bf16.msra.mxu2 %v1181_v13  ;;  %v1188_v17 = vld [vmem:[#allocation8 + $0x70] sm:$0xff]  ;;  %v1187_v20 = vld [vmem:[#allocation8 + $0x68] sm:$0xff]  ;;  %s875_s3 = sshll.u32 %s433_s2, 4  ;;  %s877_s14 = sshll.u32 %s874_s19, 4  ;;  %s876_s3 = int_to_ptr.vmem [resolvable:$true] %s875_s3  ;;  %s878_s14 = int_to_ptr.hbm [resolvable:$true] %s877_s14 }
  0x4b   : > { %654 = vmatpush.bf16.msra.mxu3 %v1189_v14  ;;  %v1178_v21 = vld [vmem:[#allocation8 + $0x20] sm:$0xff]  ;;  %v1177_v23 = vld [vmem:[#allocation8 + $0x18] sm:$0xff]  ;;  %v1176_v25 = vld [vmem:[#allocation8 + $0x10] sm:$0xff]  ;;  %s863_s17 = scalar_lea.sflag [#allocation4], %s1770_s13  ;;  %s1520_s16 = sshra.s32 %s878_s14, 4  ;;  %s1521_s16 = int_to_ptr.hbm [resolvable:$true] %s1520_s16 }
  0x4c   : > { %481 = vmatpush.bf16.msra.mxu0 %v1021_v11  ;;  %v1186_v22 = vld [vmem:[#allocation8 + $0x60] sm:$0xff]  ;;  %v1185_v24 = vld [vmem:[#allocation8 + $0x58] sm:$0xff]  ;;  %v1184_v26 = vld [vmem:[#allocation8 + $0x50] sm:$0xff]  ;;  %s1522_s26 = scalar_lea.hbm %s1521_s16, 8  ;;  %s1526_s24 = scalar_lea.hbm %s1842_s9, 16 }
  0x4d   : > { %495 = vmatpush.bf16.msra.mxu1 %v1025_v15  ;;  %v1175_v27 = vld [vmem:[#allocation8 + $0x8] sm:$0xff]  ;;  %v1174_v29 = vld [vmem:[#allocation8] sm:$0xff]  ;;  %v1197_v31 = vld [vmem:[#allocation10 + $0x38] sm:$0xff]  ;;  %p1523_p1 = scmp.ne.s32.totalorder %s1521_s16, %s1522_s26  ;;  %p1527_p12 = scmp.lt.s32.totalorder %s1521_s16, %s1842_s9 }
  0x4e   : > { %641 = vmatpush.bf16.msra.mxu2 %v1180_v16  ;;  %v1183_v28 = vld [vmem:[#allocation8 + $0x48] sm:$0xff]  ;;  %v1182_v30 = vld [vmem:[#allocation8 + $0x40] sm:$0xff]  ;;  %v1196_v32 = vld [vmem:[#allocation10 + $0x30] sm:$0xff]  ;;  %p1528_p8 = scmp.lt.s32.totalorder %s1526_s24, %s1522_s26 }
  0x4f   : > { %655 = vmatpush.bf16.msra.mxu3 %v1188_v17  ;;  %1034 = vmatmul.msk.bf16.vlgmr.msra.gmra.mxu0 %vm470_vm0, %v439_v18  ;;  %v1195_v33 = vld [vmem:[#allocation10 + $0x28] sm:$0xff]  ;;  %v1194_v34 = vld [vmem:[#allocation10 + $0x20] sm:$0xff]  ;;  %v444_v35 = vld [vmem:[#allocation7] sm:$0x3]  ;;  %p1524_p3 = pnand %p1523_p1, %p1736_p13 }
  0x50   : > { %1035 = vmatmul.msk.bf16.vlgmr.msra.gmra.mxu1 %vm470_vm0, %v439_v18  ;;  %739 = vmatpush.bf16.msrb.mxu0 %v1197_v31  ;;  %v446_v38 = vperm.slane %v444_v35, 0  ;;  %v447_v39 = vperm.slane %v444_v35, 1  ;;  %v1193_v52 = vld [vmem:[#allocation10 + $0x18] sm:$0xff]  ;;  %v1192_v53 = vld [vmem:[#allocation10 + $0x10] sm:$0xff]  ;;  %v1191_v54 = vld [vmem:[#allocation10 + $0x8] sm:$0xff]  ;;  %p1529_p7 = por %p1528_p8, %p1527_p12 }
  0x51   : > { %v1190_v55 = vld [vmem:[#allocation10] sm:$0xff]  ;;  %v1205_v56 = vld [vmem:[#allocation11 + $0x38] sm:$0xff]  ;;  %v1204_v57 = vld [vmem:[#allocation11 + $0x30] sm:$0xff]  ;;  %p1525_p5 = pneg %p1524_p3 }
  0x52   : > { %642 = vmatpush.bf16.msra.mxu2 %v1179_v19  ;;  %824 = vmatpush.bf16.msrb.mxu1 %v1205_v56  ;;  %v1203_v58 = vld [vmem:[#allocation11 + $0x28] sm:$0xff]  ;;  %v1202_v59 = vld [vmem:[#allocation11 + $0x20] sm:$0xff]  ;;  %v1315_v61 = vld [vmem:[%s1837_s4] ss:$0 sm:$0xff] }
  0x53   : > { %656 = vmatpush.bf16.msra.mxu3 %v1187_v20  ;;  %v1201_v8 = vld [vmem:[#allocation11 + $0x18] sm:$0xff]  ;;  %v1200_v9 = vld [vmem:[#allocation11 + $0x10] sm:$0xff]  ;;  %v1199_v10 = vld [vmem:[#allocation11 + $0x8] sm:$0xff]  ;;  %p1530_p9 = pnand %p1529_p7, %p1525_p5 }
  0x54   : > { %740 = vmatpush.bf16.msrb.mxu0 %v1196_v32  ;;  %v1198_v11 = vld [vmem:[#allocation11] sm:$0xff]  ;;  %v1316_v13 = vld [vmem:[%s1839_s6] ss:$0 sm:$0xff] }
  0x55   : > { %v1317_v20 = vld [vmem:[%s1841_s8] ss:$0 sm:$0xff] }
  0x56   : > { %643 = vmatpush.bf16.msra.mxu2 %v1178_v21  ;;  %825 = vmatpush.bf16.msrb.mxu1 %v1204_v57 }
  0x57   : > { %657 = vmatpush.bf16.msra.mxu3 %v1186_v22 }
  0x58   : > { %741 = vmatpush.bf16.msrb.mxu0 %v1195_v33 }
  0x5a   : > { %644 = vmatpush.bf16.msra.mxu2 %v1177_v23  ;;  %826 = vmatpush.bf16.msrb.mxu1 %v1203_v58 }
  0x5b   : > { %658 = vmatpush.bf16.msra.mxu3 %v1185_v24 }
  0x5c   : > { %742 = vmatpush.bf16.msrb.mxu0 %v1194_v34 }
  0x5e   : > { %645 = vmatpush.bf16.msra.mxu2 %v1176_v25  ;;  %827 = vmatpush.bf16.msrb.mxu1 %v1202_v59 }
  0x5f   : > { %659 = vmatpush.bf16.msra.mxu3 %v1184_v26 }
  0x60   : > { %743 = vmatpush.bf16.msrb.mxu0 %v1193_v52 }
  0x62   : > { %646 = vmatpush.bf16.msra.mxu2 %v1175_v27  ;;  %828 = vmatpush.bf16.msrb.mxu1 %v1201_v8 }
  0x63   : > { %660 = vmatpush.bf16.msra.mxu3 %v1183_v28 }
  0x64   : > { %744 = vmatpush.bf16.msrb.mxu0 %v1192_v53 }
  0x66   : > { %647 = vmatpush.bf16.msra.mxu2 %v1174_v29  ;;  %829 = vmatpush.bf16.msrb.mxu1 %v1200_v9 }
  0x67   : > { %661 = vmatpush.bf16.msra.mxu3 %v1182_v30 }
  0x68   : > { %745 = vmatpush.bf16.msrb.mxu0 %v1191_v54 }
  0x6a   : > { %830 = vmatpush.bf16.msrb.mxu1 %v1199_v10 }
  0x6c   : > { %746 = vmatpush.bf16.msrb.mxu0 %v1190_v55 }
  0x6e   : > { %831 = vmatpush.bf16.msrb.mxu1 %v1198_v11 }
  0xcc   : > { %v483_v36 = vpop.f32.mrf.mxu0 }
  0xcd   : > { %v497_v37 = vpop.f32.mrf.mxu1  ;;  %v484_v40 = vadd.f32 %v483_v36, %v446_v38 }
  0xce   : > { %v498_v41 = vadd.f32 %v497_v37, %v447_v39 }
  0xcf   : > { %v502_v46 = vmax.f32 %v484_v40, 0.0 }
  0xd0   : > { %v503_v48 = vmax.f32 %v498_v41, 0.0 }
  0xd4   : > { %v485_v42 = vpop.f32.mrf.mxu0 }
  0xd5   : > { %v486_v43 = vadd.f32 %v485_v42, %v446_v38  ;;  %v499_v44 = vpop.f32.mrf.mxu1 }
  0xd6   : > { %v500_v45 = vadd.f32 %v499_v44, %v447_v39 }
  0xd7   : > { %v504_v47 = vmax.f32 %v486_v43, 0.0 }
  0xd8   : > { %v505_v49 = vmax.f32 %v500_v45, 0.0 }
  0xd9   : > { %v506_v50 = vpack.c.bf16 %v504_v47, %v502_v46 }
  0xda   : > { %v507_v51 = vpack.c.bf16 %v505_v49, %v503_v48 }
  0xdb   : > { %648 = vmatmul.bf16.vlgmr.msra.gmra.mxu2 %v506_v50 }
  0xdc   : > { %662 = vmatmul.bf16.vlgmr.msra.gmra.mxu3 %v507_v51 }
 0x15e   : > { %v649_v60 = vpop.f32.mrf.mxu2 }
 0x15f   : > { %v663_v62 = vpop.f32.mrf.mxu3  ;;  %v650_v63 = vadd.f32 %v1315_v61, %v649_v60 }
 0x161   : > { %v664_v1 = vadd.f32 %v663_v62, %v650_v63 }
 0x163   : > { %v668_v5 = vmax.f32 %v664_v1, 0.0 }
 0x166   : > { %v651_v0 = vpop.f32.mrf.mxu2 }
 0x167   : > { %v652_v2 = vadd.f32 %v1315_v61, %v651_v0  ;;  %v665_v3 = vpop.f32.mrf.mxu3 }
 0x169   : > { %v666_v4 = vadd.f32 %v665_v3, %v652_v2 }
 0x16b   : > { %v669_v6 = vmax.f32 %v666_v4, 0.0 }
 0x16d   : > { %v670_v7 = vpack.c.bf16 %v669_v6, %v668_v5 }
 0x16f   : > { %747 = vmatmul.bf16.vlgmr.msrb.gmra.mxu0 %v670_v7 }
 0x1ec   : > { %v748_v12 = vpop.f32.mrf.mxu0 }
 0x1ed   : > { %v749_v14 = vadd.f32 %v1316_v13, %v748_v12 }
 0x1ef   : > { %v753_v17 = vmax.f32 %v749_v14, 0.0 }
 0x1f4   : > { %v750_v15 = vpop.f32.mrf.mxu0 }
 0x1f5   : > { %v751_v16 = vadd.f32 %v1316_v13, %v750_v15 }
 0x1f7   : > { %v754_v18 = vmax.f32 %v751_v16, 0.0 }
 0x1f9   : > { %v755_v19 = vpack.c.bf16 %v754_v18, %v753_v17 }
 0x1fb   : > { %832 = vmatmul.bf16.vlgmr.msrb.gmra.mxu1 %v755_v19 }
 0x278   : > { %v833_v21 = vpop.f32.mrf.mxu1 }
 0x279   : > { %v834_v22 = vadd.f32 %v1317_v20, %v833_v21 }
 0x27b   : > { %838 = vmax.xlane.f32.xlu0 %v834_v22 }
 0x280   : > { %v835_v23 = vpop.f32.mrf.mxu1 }
 0x281   : > { %v836_v24 = vadd.f32 %v1317_v20, %v835_v23 }
 0x283   : > { %840 = vmax.xlane.f32.xlu0 %v836_v24 }
 0x2ee   : > { %v839_v25 = vpop.xlane.xlu0 %838 }
 0x2ef   : > { %v842_v26 = vsub.f32 %v834_v22, %v839_v25 }
 0x2f1   : > { %v844_v27 = vmul.f32 1.442695, %v842_v26 }
 0x2f3   : > { %1318 = vpow2.f32 %v844_v27 }
 0x2f6   : > { %v841_v28 = vpop.xlane.xlu0 %840 }
 0x2f7   : > { %v843_v29 = vsub.f32 %v836_v24, %v841_v28 }
 0x2f9   : > { %v1319_v30 = vpop.eup %1318  ;;  %v846_v31 = vmul.f32 1.442695, %v843_v29 }
 0x2fa   : > { %848 = vadd.xlane.f32.xlu1 %v1319_v30 }
 0x2fb   : > { %1320 = vpow2.f32 %v846_v31 }
 0x301   : > { %v1321_v32 = vpop.eup %1320 }
 0x302   : > { %850 = vadd.xlane.f32.xlu1 %v1321_v32 }
 0x36d   : > { %v849_v33 = vpop.xlane.xlu1 %848 }
 0x36e   : > { %1322 = vlog2.f32 %v849_v33 }
 0x374   : > { %v1323_v35 = vpop.eup %1322 }
 0x375   : > { %v851_v34 = vpop.xlane.xlu1 %850  ;;  %v853_v36 = vmul.f32 0.6931472, %v1323_v35 }
 0x376   : > { %1324 = vlog2.f32 %v851_v34 }
 0x377   : > { %v856_v39 = vsub.f32 %v842_v26, %v853_v36 }
 0x37c   : > { %v1325_v37 = vpop.eup %1324 }
 0x37d   : > { %v855_v38 = vmul.f32 0.6931472, %v1325_v37 }
 0x37f   : > { %v857_v40 = vsub.f32 %v843_v29, %v855_v38 }
 0x381   : > { %v1210_v41 = vpack.c.bf16 %v857_v40, %v856_v39 }
 0x383   : > { %1211 = vst [vmem:[%s433_s2] sm:$0xff] %v1210_v41  }
 0x384   : > { %1533 = shalt.err (!%p1530_p9)
}
 0x385   : > { %s1595_s13 = smov 64   ;;  %s1596_s1 = smov 4  }
 0x386   : > { %1234 = dma.vmem_to_hbm [thread:$0]  (%p1736_p13), %s876_s3, 128, %s878_s14, %s863_s17, %s1595_s13, %s1595_s13, %s1596_s1  }
 0x387 PF: > { %s892_s18 = sand.u32 1, %s1572_s30   ;;  %p1859_p10 = scmp.ge.s32.totalorder %s1584_s12, 2 }
 0x388   : > { %s893_s29 = scalar_lea.sflag [#allocation4], %s892_s18 }
 0x389   : > { %p1257_p11 = pnand %p1859_p10, %p1741_p4 }
 0x38b   : > { %p1258_p0 = pneg %p1257_p11 }
 0x38d   : > { %1567 = dma.done.wait (%p1258_p0), %s893_s29, 128  }
 0x38e   : > { %1569 = vsyncadd (%p1258_p0), %s893_s29, 4294967168  ;;  %p25_p2 = scmp.ge.s32.totalorder %s1716_s21, 4   ;;  %s1860_s30 = smov %s1576_s10 }
 0x38f   : > { %s1861_s10 = smov %s1580_s11  ;;  %s1862_s11 = smov %s1728_s15 }
 0x390   : > { %s1863_s12 = smov %s1716_s21  ;;  %27 = sbr.rel (!%p25_p2) target bundleno = 12 (0xc), region = 121 }
 0x395   :  { %899 = vsyncpa [#allocation3], 1 }
 0x396   :  { %901 = vsyncpa [#allocation3 + $0x1], 1 }
 0x397   :  { %902 = vsyncpa [#allocation6], 1 }
 0x398   :  { %903 = vsyncpa [#allocation9], 1 }
 0x399   :  { %904 = vsyncpa [#allocation12], 1 }
 0x39a   :  { %905 = vsyncpa [#allocation4], 1 }
 0x39b   :  { %907 = vsyncpa [#allocation4 + $0x1], 1 }

</bundles_post_ra>
